<compile_context>
chip_gen: v7x
topology: tpu7x:2x2x1
jax: 0.10.0
libtpu: 0.0.40
codegen_flags: <defaults>
</compile_context>

<pallas_src>
import jax
import jax.numpy as jnp
from jax import lax
from jax.experimental import pallas as pl
from jax.experimental.pallas import tpu as pltpu


# ---------------------------------------------------------------------------
# Kernel 1: one-hot mask (bf16) + max-margin errors (f32), per (sample, tile)
# ---------------------------------------------------------------------------
def _margin_kernel(x_ref, t_ref, mask_ref, err_ref):
    x = x_ref[0]                                   # (C, THW) f32
    t = t_ref[0]                                   # (1, THW) i32
    c_idx = lax.broadcasted_iota(jnp.int32, x.shape, 0)
    onehot = c_idx == t                            # one-hot over channel dim
    mask_ref[0] = onehot.astype(jnp.bfloat16)      # 0/1 exact in bf16
    # err = 1 - (2*mask - 1) * x  ==  1 - x (true class)  /  1 + x (others)
    err_ref[0] = jnp.where(onehot, 1.0 - x, 1.0 + x)


# ---------------------------------------------------------------------------
# Kernel 2: per-sample Lovasz extension on (already sorted) errors/labels.
#   err_ref/lab_ref blocks are (1, B, T); flat sorted index = b*T + t.
#   tri_ref is a (T, T) bf16 inclusive upper-triangular matrix, resident
#   across the whole grid (index_map returns the same block every step).
# ---------------------------------------------------------------------------
def _lovasz_reduce_kernel(err_ref, lab_ref, tri_ref, out_ref):
    err = err_ref[0]                               # (B, T) f32
    lab_bf = lab_ref[0]                            # (B, T) bf16 (exact 0/1)
    lab = lab_bf.astype(jnp.float32)
    tri = tri_ref[...]                             # (T, T) bf16
    B, T = lab.shape

    # Intra-block inclusive cumsum on the MXU (bf16 in, f32 accumulate: exact).
    intra = jnp.dot(lab_bf, tri, preferred_element_type=jnp.float32)      # (B, T)

    # Cross-block carry: prefix[b] = number of positives in blocks < b.
    r = lax.broadcasted_iota(jnp.int32, (B, B), 0)
    c = lax.broadcasted_iota(jnp.int32, (B, B), 1)
    strict = (c < r).astype(jnp.bfloat16)                                  # (B, B)
    carry = jnp.dot(strict, lab_bf, preferred_element_type=jnp.float32)    # (B, T)
    prefix = jnp.sum(carry, axis=-1, keepdims=True)                        # (B, 1)

    cs = intra + prefix                            # inclusive cumsum, flat order

    row_tot = jnp.sum(lab, axis=-1, keepdims=True)                         # (B, 1)
    total = jnp.sum(row_tot, axis=0, keepdims=True)                        # (1, 1)

    # 1-based global position of each element in the sorted flat order.
    bi = lax.broadcasted_iota(jnp.int32, (B, T), 0)
    ti = lax.broadcasted_iota(jnp.int32, (B, T), 1)
    pos = (bi * T + ti + 1).astype(jnp.float32)

    inter = total - cs
    union = total + (pos - cs)                     # total + cumsum(1 - lab)
    iou = 1.0 - inter * pl.reciprocal(union, approx=False)

    # iou at the previous flat position, computed elementwise from the
    # exclusive cumsum (cs - lab) -- no (P,P) diff matmul, no roll.  At flat
    # index 0 this evaluates to 0 (total > 0 always here), so grad[0] = iou[0].
    cs_ex = cs - lab
    inter_p = total - cs_ex
    union_p = total + ((pos - 1.0) - cs_ex)
    iou_prev = 1.0 - inter_p * pl.reciprocal(union_p, approx=False)

    grad = iou - iou_prev
    contrib = jnp.maximum(err, 0.0) * grad                                 # (B, T)
    row = jnp.sum(contrib, axis=-1, keepdims=True)                         # (B, 1)
    out_ref[0] = jnp.sum(row, axis=0, keepdims=True)                       # (1, 1)


# ---------------------------------------------------------------------------
# Tiling helpers
# ---------------------------------------------------------------------------
def _spatial_tile(hw):
    """Largest lane-aligned tile that divides HW (falls back to HW)."""
    for t in (16384, 8192, 4096, 2048, 1024, 512, 256, 128):
        if hw % t == 0:
            return t
    return hw


def _lane_block(p):
    """Lane width T for the blocked cumsum (prefers >= 8 sublane rows)."""
    if p >= 8 * 512:
        return 512
    if p >= 8 * 256:
        return 256
    return 128


# ---------------------------------------------------------------------------
# Wrapper
# ---------------------------------------------------------------------------
def lovasz_loss_2d(inputs, targets):
    """inputs: (N, C, H, W) float32, targets: (N, H, W) int32 class indices."""
    N, C, H, W = inputs.shape
    HW = H * W
    P = C * HW

    x3 = inputs.reshape(N, C, HW).astype(jnp.float32)
    t3 = targets.reshape(N, 1, HW).astype(jnp.int32)

    thw = _spatial_tile(HW)
    n_sp = HW // thw

    masks_bf, errors_f = pl.pallas_call(
        _margin_kernel,
        out_shape=(jax.ShapeDtypeStruct((N, C, HW), jnp.bfloat16),
                   jax.ShapeDtypeStruct((N, C, HW), jnp.float32)),
        grid_spec=pltpu.PrefetchScalarGridSpec(
            num_scalar_prefetch=0,
            grid=(N, n_sp),
            in_specs=[pl.BlockSpec((1, C, thw), lambda n, s: (n, 0, s)),
                      pl.BlockSpec((1, 1, thw), lambda n, s: (n, 0, s))],
            out_specs=[pl.BlockSpec((1, C, thw), lambda n, s: (n, 0, s)),
                       pl.BlockSpec((1, C, thw), lambda n, s: (n, 0, s))]),
        compiler_params=pltpu.CompilerParams(
            dimension_semantics=("parallel", "parallel")),
    )(x3, t3)

    errors = errors_f.reshape(N, P)
    masks = masks_bf.reshape(N, P)

    # TODO(synk): descending sort has no Pallas/Mosaic TPU lowering — JAX glue.
    order = jnp.argsort(-errors, axis=1)
    errors_sorted = jnp.take_along_axis(errors, order, axis=1)
    labels_sorted = jnp.take_along_axis(masks, order, axis=1)

    T = _lane_block(P)
    B = -(-P // T)
    p_pad = B * T
    if p_pad != P:
        # Padded tail: err=0 (relu->0) and lab=0, so it contributes nothing and
        # does not perturb cumsums of the real prefix.
        pad = p_pad - P
        errors_sorted = jnp.concatenate(
            [errors_sorted, jnp.zeros((N, pad), errors_sorted.dtype)], axis=1)
        labels_sorted = jnp.concatenate(
            [labels_sorted, jnp.zeros((N, pad), labels_sorted.dtype)], axis=1)

    err_blk = errors_sorted.reshape(N, B, T)
    lab_blk = labels_sorted.reshape(N, B, T)

    k = jnp.arange(T, dtype=jnp.int32)
    tri = (k[:, None] <= k[None, :]).astype(jnp.bfloat16)   # (T, T), built once

    per_sample = pl.pallas_call(
        _lovasz_reduce_kernel,
        out_shape=jax.ShapeDtypeStruct((N, 1, 1), jnp.float32),
        grid_spec=pltpu.PrefetchScalarGridSpec(
            num_scalar_prefetch=0,
            grid=(N,),
            in_specs=[pl.BlockSpec((1, B, T), lambda n: (n, 0, 0)),
                      pl.BlockSpec((1, B, T), lambda n: (n, 0, 0)),
                      pl.BlockSpec((T, T), lambda n: (0, 0))],
            out_specs=pl.BlockSpec((1, 1, 1), lambda n: (n, 0, 0))),
        compiler_params=pltpu.CompilerParams(dimension_semantics=("parallel",)),
    )(err_blk, lab_blk, tri)

    return jnp.sum(per_sample) / N


# ---------------------------------------------------------------------------
# Pure-JAX reference (mirrors the PyTorch forward exactly)
# ---------------------------------------------------------------------------
def _lovasz_ref(inputs, targets):
    N, C, H, W = inputs.shape
    masks = jax.nn.one_hot(targets, C, axis=1, dtype=inputs.dtype)  # (N,C,H,W)
    loss = 0.0
    for n in range(N):
        mask = masks[n].reshape(-1)
        inp = inputs[n].reshape(-1)
        errors = 1.0 - (mask * 2.0 - 1.0) * inp
        order = jnp.argsort(-errors)
        es = errors[order]
        ls = mask[order]
        gts = ls.sum()
        inter = gts - jnp.cumsum(ls)
        union = gts + jnp.cumsum(1.0 - ls)
        iou = 1.0 - inter / union
        iou = jnp.concatenate([iou[:1], iou[1:] - iou[:-1]])
        loss = loss + jnp.dot(jax.nn.relu(es), iou)
    return loss / N


if __name__ == "__main__":
    key = jax.random.PRNGKey(0)
    k1, k2 = jax.random.split(key)
    N, C, H, W = 2, 4, 16, 16
    inputs = jax.random.normal(k1, (N, C, H, W), dtype=jnp.float32)
    targets = jax.random.randint(k2, (N, H, W), 0, C, dtype=jnp.int32)

    loss = jax.jit(lovasz_loss_2d)(inputs, targets)
    loss = jax.block_until_ready(loss)

    ref = _lovasz_ref(inputs, targets)
    assert jnp.allclose(loss, ref, rtol=1e-4, atol=1e-5), (loss, ref)
    print("KERNEL_OK")
</pallas_src>

<mosaic_0001>
module attributes {stable_mosaic.version = 11 : i64} {
  func.func private @main(%arg0: i32) attributes {dimension_semantics = [#tpu.dimension_semantics<core_parallel>], iteration_bounds = array<i64: 2>, tpu.core_type = #tpu.core_type<sc_scalar_subcore>, window_params = []} {
    return
  }
}

module attributes {stable_mosaic.version = 11 : i64} {
  func.func private @main(%arg0: i32) attributes {dimension_semantics = [#tpu.dimension_semantics<core_parallel>], iteration_bounds = array<i64: 2>, tpu.core_type = #tpu.core_type<sc_scalar_subcore>, window_params = []} {
    return
  }
}

module attributes {stable_mosaic.version = 11 : i64} {
  func.func @_margin_kernel(%arg0: i32, %arg1: i32, %arg2: memref<1x4x256xf32, #tpu.memory_space<vmem>>, %arg3: memref<1x1x256xi32, #tpu.memory_space<vmem>>, %arg4: memref<1x4x256xbf16, #tpu.memory_space<vmem>>, %arg5: memref<1x4x256xf32, #tpu.memory_space<vmem>>) attributes {dimension_semantics = [#tpu.dimension_semantics<parallel>, #tpu.dimension_semantics<parallel>], iteration_bounds = array<i64: 2, 1>, scalar_prefetch = 0 : i64, scratch_operands = 0 : i64, tpu.core_type = #tpu.core_type<tc>, window_params = [{transform_indices = @transform_0, window_bounds = array<i64: 1, 4, 256>}, {transform_indices = @transform_1, window_bounds = array<i64: 1, 1, 256>}, {transform_indices = @transform_2, window_bounds = array<i64: 1, 4, 256>}, {transform_indices = @transform_3, window_bounds = array<i64: 1, 4, 256>}]} {
    %c0 = arith.constant 0 : index
    %c0_0 = arith.constant 0 : index
    %c0_1 = arith.constant 0 : index
    %0 = vector.load %arg2[%c0, %c0_0, %c0_1] : memref<1x4x256xf32, #tpu.memory_space<vmem>>, vector<1x4x256xf32>
    %1 = vector.shape_cast %0 : vector<1x4x256xf32> to vector<4x256xf32>
    %c0_2 = arith.constant 0 : index
    %c0_3 = arith.constant 0 : index
    %c0_4 = arith.constant 0 : index
    %2 = vector.load %arg3[%c0_2, %c0_3, %c0_4] : memref<1x1x256xi32, #tpu.memory_space<vmem>>, vector<1x1x256xi32>
    %3 = vector.shape_cast %2 : vector<1x1x256xi32> to vector<1x256xi32>
    %4 = tpu.iota {dimensions = array<i32: 0>} : vector<4x256xi32>
    %5 = vector.broadcast %3 : vector<1x256xi32> to vector<4x256xi32>
    %6 = arith.cmpi eq, %4, %5 : vector<4x256xi32>
    %7 = arith.extui %6 : vector<4x256xi1> to vector<4x256xi32>
    %8 = arith.sitofp %7 : vector<4x256xi32> to vector<4x256xf32>
    %9 = arith.truncf %8 : vector<4x256xf32> to vector<4x256xbf16>
    %c0_5 = arith.constant 0 : index
    %c0_6 = arith.constant 0 : index
    %c0_7 = arith.constant 0 : index
    %10 = vector.load %arg4[%c0_5, %c0_6, %c0_7] : memref<1x4x256xbf16, #tpu.memory_space<vmem>>, vector<1x4x256xbf16>
    %11 = vector.shape_cast %10 : vector<1x4x256xbf16> to vector<4x256xbf16>
    %12 = vector.shape_cast %9 : vector<4x256xbf16> to vector<1x4x256xbf16>
    tpu.vector_store %arg4[%c0_5, %c0_6, %c0_7], %12 {strides = array<i32>} : memref<1x4x256xbf16, #tpu.memory_space<vmem>>, vector<1x4x256xbf16>,
    %cst = arith.constant 1.000000e+00 : f32
    %13 = vector.broadcast %cst : f32 to vector<4x256xf32>
    %14 = arith.subf %13, %1 : vector<4x256xf32>
    %cst_8 = arith.constant 1.000000e+00 : f32
    %15 = vector.broadcast %cst_8 : f32 to vector<4x256xf32>
    %16 = arith.addf %15, %1 : vector<4x256xf32>
    %17 = arith.select %6, %14, %16 : vector<4x256xi1>, vector<4x256xf32>
    %c0_9 = arith.constant 0 : index
    %c0_10 = arith.constant 0 : index
    %c0_11 = arith.constant 0 : index
    %18 = vector.load %arg5[%c0_9, %c0_10, %c0_11] : memref<1x4x256xf32, #tpu.memory_space<vmem>>, vector<1x4x256xf32>
    %19 = vector.shape_cast %18 : vector<1x4x256xf32> to vector<4x256xf32>
    %20 = vector.shape_cast %17 : vector<4x256xf32> to vector<1x4x256xf32>
    tpu.vector_store %arg5[%c0_9, %c0_10, %c0_11], %20 {strides = array<i32>} : memref<1x4x256xf32, #tpu.memory_space<vmem>>, vector<1x4x256xf32>,
    return
  }
  func.func @transform_0(%arg0: i32, %arg1: i32) -> (i32, i32, i32) {
    %c0_i32 = arith.constant 0 : i32
    %c0_i32_0 = arith.constant 0 : i32
    return %arg0, %c0_i32, %arg1 : i32, i32, i32
  }
  func.func @transform_1(%arg0: i32, %arg1: i32) -> (i32, i32, i32) {
    %c0_i32 = arith.constant 0 : i32
    %c0_i32_0 = arith.constant 0 : i32
    return %arg0, %c0_i32, %arg1 : i32, i32, i32
  }
  func.func @transform_2(%arg0: i32, %arg1: i32) -> (i32, i32, i32) {
    %c0_i32 = arith.constant 0 : i32
    %c0_i32_0 = arith.constant 0 : i32
    return %arg0, %c0_i32, %arg1 : i32, i32, i32
  }
  func.func @transform_3(%arg0: i32, %arg1: i32) -> (i32, i32, i32) {
    %c0_i32 = arith.constant 0 : i32
    %c0_i32_0 = arith.constant 0 : i32
    return %arg0, %c0_i32, %arg1 : i32, i32, i32
  }
}

module attributes {stable_mosaic.version = 11 : i64} {
  func.func @_lovasz_reduce_kernel(%arg0: i32, %arg1: memref<1x8x128xf32, #tpu.memory_space<vmem>>, %arg2: memref<1x8x128xbf16, #tpu.memory_space<vmem>>, %arg3: memref<128x128xbf16, #tpu.memory_space<vmem>>, %arg4: memref<1x1x1xf32, #tpu.memory_space<vmem>>) attributes {dimension_semantics = [#tpu.dimension_semantics<parallel>], iteration_bounds = array<i64: 2>, scalar_prefetch = 0 : i64, scratch_operands = 0 : i64, tpu.core_type = #tpu.core_type<tc>, window_params = [{transform_indices = @transform_0, window_bounds = array<i64: 1, 8, 128>}, {transform_indices = @transform_1, window_bounds = array<i64: 1, 8, 128>}, {pipeline_mode = #tpu.pipeline_mode<synchronous>, transform_indices = @transform_2, window_bounds = array<i64: 128, 128>}, {transform_indices = @transform_3, window_bounds = array<i64: 1, 1, 1>}]} {
    %c0 = arith.constant 0 : index
    %c0_0 = arith.constant 0 : index
    %c0_1 = arith.constant 0 : index
    %0 = vector.load %arg1[%c0, %c0_0, %c0_1] : memref<1x8x128xf32, #tpu.memory_space<vmem>>, vector<1x8x128xf32>
    %1 = vector.shape_cast %0 : vector<1x8x128xf32> to vector<8x128xf32>
    %c0_2 = arith.constant 0 : index
    %c0_3 = arith.constant 0 : index
    %c0_4 = arith.constant 0 : index
    %2 = vector.load %arg2[%c0_2, %c0_3, %c0_4] : memref<1x8x128xbf16, #tpu.memory_space<vmem>>, vector<1x8x128xbf16>
    %3 = vector.shape_cast %2 : vector<1x8x128xbf16> to vector<8x128xbf16>
    %4 = arith.extf %3 : vector<8x128xbf16> to vector<8x128xf32>
    %c0_5 = arith.constant 0 : index
    %c0_6 = arith.constant 0 : index
    %5 = vector.load %arg3[%c0_5, %c0_6] : memref<128x128xbf16, #tpu.memory_space<vmem>>, vector<128x128xbf16>
    %cst = arith.constant dense<0.000000e+00> : vector<8x128xf32>
    %6 = tpu.matmul %3, %5, %cst {dimension_numbers = #tpu.dot_dimension_numbers<[1], [0], [0], [1], [0, 0, 1, 1], [], []>} : vector<8x128xbf16>, vector<128x128xbf16>, vector<8x128xf32> -> vector<8x128xf32>
    %7 = tpu.iota {dimensions = array<i32: 0>} : vector<8x8xi32>
    %8 = tpu.iota {dimensions = array<i32: 1>} : vector<8x8xi32>
    %9 = arith.cmpi slt, %8, %7 : vector<8x8xi32>
    %10 = arith.extui %9 : vector<8x8xi1> to vector<8x8xi32>
    %11 = arith.sitofp %10 : vector<8x8xi32> to vector<8x8xf32>
    %12 = arith.truncf %11 : vector<8x8xf32> to vector<8x8xbf16>
    %cst_7 = arith.constant dense<0.000000e+00> : vector<8x128xf32>
    %13 = tpu.matmul %12, %3, %cst_7 {dimension_numbers = #tpu.dot_dimension_numbers<[1], [0], [0], [1], [0, 0, 1, 1], [], []>} : vector<8x8xbf16>, vector<8x128xbf16>, vector<8x128xf32> -> vector<8x128xf32>
    %cst_8 = arith.constant dense<0.000000e+00> : vector<8xf32>
    %14 = vector.multi_reduction <add>, %13, %cst_8 [1] : vector<8x128xf32> to vector<8xf32>
    %15 = vector.shape_cast %14 : vector<8xf32> to vector<8x1xf32>
    %16 = vector.broadcast %15 : vector<8x1xf32> to vector<8x128xf32>
    %17 = arith.addf %6, %16 : vector<8x128xf32>
    %cst_9 = arith.constant dense<0.000000e+00> : vector<8xf32>
    %18 = vector.multi_reduction <add>, %4, %cst_9 [1] : vector<8x128xf32> to vector<8xf32>
    %19 = vector.shape_cast %18 : vector<8xf32> to vector<8x1xf32>
    %cst_10 = arith.constant dense<0.000000e+00> : vector<1xf32>
    %20 = vector.multi_reduction <add>, %19, %cst_10 [0] : vector<8x1xf32> to vector<1xf32>
    %21 = vector.shape_cast %20 : vector<1xf32> to vector<1x1xf32>
    %22 = tpu.iota {dimensions = array<i32: 0>} : vector<8x128xi32>
    %23 = tpu.iota {dimensions = array<i32: 1>} : vector<8x128xi32>
    %c128_i32 = arith.constant 128 : i32
    %24 = vector.broadcast %c128_i32 : i32 to vector<8x128xi32>
    %25 = arith.muli %22, %24 : vector<8x128xi32>
    %26 = arith.addi %25, %23 : vector<8x128xi32>
    %c1_i32 = arith.constant 1 : i32
    %27 = vector.broadcast %c1_i32 : i32 to vector<8x128xi32>
    %28 = arith.addi %26, %27 : vector<8x128xi32>
    %29 = arith.sitofp %28 : vector<8x128xi32> to vector<8x128xf32>
    %30 = vector.broadcast %21 : vector<1x1xf32> to vector<8x128xf32>
    %31 = arith.subf %30, %17 : vector<8x128xf32>
    %32 = arith.subf %29, %17 : vector<8x128xf32>
    %33 = vector.broadcast %21 : vector<1x1xf32> to vector<8x128xf32>
    %34 = arith.addf %33, %32 : vector<8x128xf32>
    %35 = tpu.reciprocal %34 : vector<8x128xf32> -> vector<8x128xf32>
    %36 = arith.mulf %31, %35 : vector<8x128xf32>
    %cst_11 = arith.constant 1.000000e+00 : f32
    %37 = vector.broadcast %cst_11 : f32 to vector<8x128xf32>
    %38 = arith.subf %37, %36 : vector<8x128xf32>
    %39 = arith.subf %17, %4 : vector<8x128xf32>
    %40 = vector.broadcast %21 : vector<1x1xf32> to vector<8x128xf32>
    %41 = arith.subf %40, %39 : vector<8x128xf32>
    %cst_12 = arith.constant 1.000000e+00 : f32
    %42 = vector.broadcast %cst_12 : f32 to vector<8x128xf32>
    %43 = arith.subf %29, %42 : vector<8x128xf32>
    %44 = arith.subf %43, %39 : vector<8x128xf32>
    %45 = vector.broadcast %21 : vector<1x1xf32> to vector<8x128xf32>
    %46 = arith.addf %45, %44 : vector<8x128xf32>
    %47 = tpu.reciprocal %46 : vector<8x128xf32> -> vector<8x128xf32>
    %48 = arith.mulf %41, %47 : vector<8x128xf32>
    %cst_13 = arith.constant 1.000000e+00 : f32
    %49 = vector.broadcast %cst_13 : f32 to vector<8x128xf32>
    %50 = arith.subf %49, %48 : vector<8x128xf32>
    %51 = arith.subf %38, %50 : vector<8x128xf32>
    %cst_14 = arith.constant 0.000000e+00 : f32
    %52 = vector.broadcast %cst_14 : f32 to vector<8x128xf32>
    %53 = arith.maximumf %1, %52 : vector<8x128xf32>
    %54 = arith.mulf %53, %51 : vector<8x128xf32>
    %cst_15 = arith.constant dense<0.000000e+00> : vector<8xf32>
    %55 = vector.multi_reduction <add>, %54, %cst_15 [1] : vector<8x128xf32> to vector<8xf32>
    %56 = vector.shape_cast %55 : vector<8xf32> to vector<8x1xf32>
    %cst_16 = arith.constant dense<0.000000e+00> : vector<1xf32>
    %57 = vector.multi_reduction <add>, %56, %cst_16 [0] : vector<8x1xf32> to vector<1xf32>
    %58 = vector.shape_cast %57 : vector<1xf32> to vector<1x1xf32>
    %c0_17 = arith.constant 0 : index
    %c0_18 = arith.constant 0 : index
    %c0_19 = arith.constant 0 : index
    %59 = vector.load %arg4[%c0_17, %c0_18, %c0_19] : memref<1x1x1xf32, #tpu.memory_space<vmem>>, vector<1x1x1xf32>
    %60 = vector.shape_cast %59 : vector<1x1x1xf32> to vector<1x1xf32>
    %61 = vector.shape_cast %58 : vector<1x1xf32> to vector<1x1x1xf32>
    tpu.vector_store %arg4[%c0_17, %c0_18, %c0_19], %61 {strides = array<i32>} : memref<1x1x1xf32, #tpu.memory_space<vmem>>, vector<1x1x1xf32>,
    return
  }
  func.func @transform_0(%arg0: i32) -> (i32, i32, i32) {
    %c0_i32 = arith.constant 0 : i32
    %c0_i32_0 = arith.constant 0 : i32
    %c0_i32_1 = arith.constant 0 : i32
    return %arg0, %c0_i32, %c0_i32_0 : i32, i32, i32
  }
  func.func @transform_1(%arg0: i32) -> (i32, i32, i32) {
    %c0_i32 = arith.constant 0 : i32
    %c0_i32_0 = arith.constant 0 : i32
    %c0_i32_1 = arith.constant 0 : i32
    return %arg0, %c0_i32, %c0_i32_0 : i32, i32, i32
  }
  func.func @transform_2(%arg0: i32) -> (i32, i32) {
    %c0_i32 = arith.constant 0 : i32
    %c0_i32_0 = arith.constant 0 : i32
    %c0_i32_1 = arith.constant 0 : i32
    return %c0_i32, %c0_i32_0 : i32, i32
  }
  func.func @transform_3(%arg0: i32) -> (i32, i32, i32) {
    %c0_i32 = arith.constant 0 : i32
    %c0_i32_0 = arith.constant 0 : i32
    %c0_i32_1 = arith.constant 0 : i32
    return %arg0, %c0_i32, %c0_i32_0 : i32, i32, i32
  }
}

</mosaic_0001>

<bundles_post_ra>
// kernel: neg.1
= control target key start
LH: loop header
LB: loop body
LE: loop exit
PB: predicated region body
PF: predicated region fallthrough
CT: control target
= control target key end

     0   :  { %s136_s0 = inlined_call_operand.vmem [shape: f32[2,1024], index: 0, kind: input, shape index: {}]   ;;  %s137_s1 = inlined_call_operand.vmem [shape: f32[2,1024], index: 1, kind: output, shape index: {}]  }
   0x1   :  { %v2_v0 = vld [vmem:[%s136_s0] sm:$0x3]  ;;  %v64_v1 = vld [vmem:[%s136_s0 + $0x2] sm:$0x3]  ;;  %v66_v2 = vld [vmem:[%s136_s0 + $0x4] sm:$0x3] }
   0x2   :  { %v5_v3 = vxor.u32 2147483648, %v2_v0  ;;  %v12_v4 = vxor.u32 2147483648, %v64_v1  ;;  %v20_v5 = vxor.u32 2147483648, %v66_v2  ;;  %v68_v6 = vld [vmem:[%s136_s0 + $0x6] sm:$0x3] }
   0x3   :  { %v28_v7 = vxor.u32 2147483648, %v68_v6  ;;  %v70_v8 = vld [vmem:[%s136_s0 + $0x8] sm:$0x3]  ;;  %v72_v9 = vld [vmem:[%s136_s0 + $0xa] sm:$0x3] }
   0x4   :  { %7 = vst [vmem:[%s137_s1] sm:$0x3] %v5_v3  ;;  %65 = vst [vmem:[%s137_s1 + $0x2] sm:$0x3] %v12_v4  ;;  %v36_v10 = vxor.u32 2147483648, %v70_v8  ;;  %v44_v11 = vxor.u32 2147483648, %v72_v9 }
   0x5   :  { %67 = vst [vmem:[%s137_s1 + $0x4] sm:$0x3] %v20_v5  ;;  %v74_v12 = vld [vmem:[%s136_s0 + $0xc] sm:$0x3]  ;;  %v76_v13 = vld [vmem:[%s136_s0 + $0xe] sm:$0x3] }
   0x6   :  { %69 = vst [vmem:[%s137_s1 + $0x6] sm:$0x3] %v28_v7  ;;  %v52_v14 = vxor.u32 2147483648, %v74_v12  ;;  %v60_v15 = vxor.u32 2147483648, %v76_v13  ;;  %71 = vst [vmem:[%s137_s1 + $0x8] sm:$0x3] %v36_v10 }
   0x7   :  { %73 = vst [vmem:[%s137_s1 + $0xa] sm:$0x3] %v44_v11 }
   0x8   :  { %75 = vst [vmem:[%s137_s1 + $0xc] sm:$0x3] %v52_v14  ;;  %77 = vst [vmem:[%s137_s1 + $0xe] sm:$0x3] %v60_v15 }

// kernel: lovasz_loss_2d.2
= control target key start
LH: loop header
LB: loop body
LE: loop exit
PB: predicated region body
PF: predicated region fallthrough
CT: control target
= control target key end

     0   :  { %s557_s12 = smov 0   ;;  %s559_s13 = smov 0   ;;  %s596_s0 = inlined_call_operand.vmem [shape: f32[2,4,256], index: 0, kind: input, shape index: {}]   ;;  %s597_s1 = inlined_call_operand.vmem [shape: s32[2,1,256], index: 1, kind: input, shape index: {}]   ;;  %s598_s2 = inlined_call_operand.vmem [shape: bf16[2,4,256], index: 2, kind: output, shape index: {0}]   ;;  %s599_s3 = inlined_call_operand.vmem [shape: f32[2,4,256], index: 3, kind: output, shape index: {1}]  }
   0x1   :  { %s561_s14 = smov 0  }
   0x2 LB: > { %s26_s15 = sadd.s32 1, %s530_s13  ;;  %p470_p0 = scmp.ge.s32.totalorder %s534_s14, 1  ;;  %s534_s14 = sphi %s561_s14, %s14_s14   ;;  %s530_s13 = sphi %s559_s13, %s601_s13   ;;  %s526_s12 = sphi %s557_s12, %s600_s12  }
   0x3   : > { %p28_p1 = scmp.ge.s32.totalorder %s26_s15, 2  ;;  %p179_p2 = scmp.lt.s32.totalorder %s534_s14, 3 }
   0x5   : > { %s603_s15 = smov (%p28_p1, %s26_s15), 0  ;;  %p180_p3 = pnand %p470_p0, %p179_p2 }
   0x6   : > { %p229_p4 = scmp.lt.s32.totalorder (!%p180_p3), %s526_s12, 1  ;;  %v269_v0 = vlaneseq (!%p180_p3)  ;;  %v536_v10 = vmov (!%p180_p3), 0.0  }
   0x7   : > { %183 = sbr.rel (%p180_p3) target bundleno = 27 (0x1b), region = 28 }
   0x8   : > { %v270_v1 = vshrl.u32 (!%p180_p3), %v269_v0, 7 }
   0xa   : > { %v273_v2 = vsub.s32 (!%p180_p3), 0, %v270_v1  ;;  %v277_v3 = vsub.s32 (!%p180_p3), 1, %v270_v1 }
   0xe   : > { %s605_s12 = smov (!%p229_p4, %s526_s12), 1 }
   0xf   : > { %s473_s16 = sshll.u32 %s605_s12, 1  ;;  %s484_s20 = sshll.u32 %s605_s12, 3 }
  0x10   : > { %s245_s19 = scalar_lea.vmem %s597_s1, %s473_s16  ;;  %s485_s21 = sshll.u32 %s605_s12, 2 }
  0x11   : > { %v268_v4 = vld [vmem:[%s245_s19] sm:$0x3]  ;;  %s236_s24 = scalar_lea.vmem %s596_s0, %s484_s20  ;;  %s255_s27 = scalar_lea.vmem %s598_s2, %s485_s21 }
  0x12   : > { %v274_v5 = vrot.slane %v268_v4, %v273_v2  ;;  %v278_v6 = vrot.slane %v268_v4, %v277_v3  ;;  %v267_v7 = vld [vmem:[%s236_s24] sm:$0xff]  ;;  %s265_s30 = scalar_lea.vmem %s599_s3, %s484_s20 }
  0x13   : > { %v299_v8 = vsub.f32 1.0, %v267_v7  ;;  %v300_v9 = vadd.f32 1.0, %v267_v7 }
  0x14   : > { %vm279_vm0 = vcmp.eq.s32.totalorder %v270_v1, %v274_v5  ;;  %vm280_vm1 = vcmp.eq.s32.totalorder %v270_v1, %v278_v6 }
  0x15   : > { %v478_v11 = vsel %vm279_vm0, 1.0, %v536_v10  ;;  %v479_v12 = vsel %vm280_vm1, 1.0, %v536_v10  ;;  %v302_v14 = vcombine.high %v299_v8, %v299_v8  ;;  %v305_v15 = vcombine.high %v300_v9, %v300_v9 }
  0x16   : > { %v480_v13 = vpack.c.bf16 %v479_v12, %v478_v11  ;;  %v307_v16 = vsel %vm279_vm0, %v299_v8, %v300_v9 }
  0x17   : > { %v308_v17 = vsel %vm280_vm1, %v302_v14, %v305_v15 }
  0x18   : > { %481 = vst.sshfl [vmem:[%s255_s27] sm:$0x33 pattern:$0x76325410] %v480_v13  ;;  %v311_v18 = vcombine.low %v307_v16, %v308_v17 }
  0x1a   : > { %313 = vst [vmem:[%s265_s30] sm:$0xff] %v311_v18 }
  0x1b PF: > { %s14_s14 = sadd.s32 1, %s534_s14   ;;  %s600_s12 = smov %s530_s13 }
  0x1c   : > { %p11_p5 = scmp.ge.s32.totalorder %s14_s14, 4   ;;  %s601_s13 = smov %s603_s15 }
  0x1e   :  { %13 = sbr.rel (!%p11_p5) target bundleno = 2 (0x2), region = 73 }

// kernel: lovasz_loss_2d.3
= control target key start
LH: loop header
LB: loop body
LE: loop exit
PB: predicated region body
PF: predicated region fallthrough
CT: control target
= control target key end

     0   :  { %s554_s12 = smov 0   ;;  %s603_s0 = inlined_call_operand.vmem [shape: f32[2,8,128], index: 0, kind: input, shape index: {}]   ;;  %s604_s1 = inlined_call_operand.vmem [shape: bf16[2,8,128], index: 1, kind: input, shape index: {}]   ;;  %s605_s2 = inlined_call_operand.vmem [shape: bf16[128,128], index: 2, kind: input, shape index: {}]   ;;  %s606_s3 = inlined_call_operand.vmem [shape: f32[2,1,1], index: 3, kind: output, shape index: {}]  }
   0x1 LB: > { %s445_s13 = sadd.s32 4294967295, %s530_s12   ;;  %p449_p0 = scmp.ge.s32.totalorder %s530_s12, 1  ;;  %s530_s12 = sphi %s554_s12, %s13_s12  }
   0x2   : > { %p145_p1 = scmp.lt.s32.totalorder %s530_s12, 3 }
   0x4   : > { %p146_p2 = pnand %p449_p0, %p145_p1 }
   0x5   : > { %p170_p3 = scmp.lt.s32.totalorder (!%p146_p2), %s445_s13, 1  ;;  %v201_v0 = vlaneseq (!%p146_p2)  ;;  %v532_v1 = vmov (!%p146_p2), 0.0   ;;  %vm533_vm0 = vmmov (!%p146_p2), 0   ;;  %v512_v2 = vld [vmem:[%s605_s2] sm:$0xff] (!%p146_p2)   ;;  %v513_v5 = vld [vmem:[%s605_s2 + $0x8] sm:$0xff] (!%p146_p2)   ;;  %vm213_vm1 = vcmask (!%p146_p2), 1043456  }
   0x6   : > { %149 = sbr.rel (%p146_p2) target bundleno = 557 (0x22d), region = 32  ;;  %476 = vmatprep.subr.bf16.mxu0 (!%p146_p2), %v532_v1  ;;  %478 = vmatprep.mubr.msk.bf16.mxu0 (!%p146_p2), %vm533_vm0, %v532_v1  ;;  %v514_v10 = vld [vmem:[%s605_s2 + $0x10] sm:$0xff] (!%p146_p2)   ;;  %vm209_vm3 = vcmask (!%p146_p2), 64512   ;;  %v515_v12 = vld [vmem:[%s605_s2 + $0x18] sm:$0xff] (!%p146_p2)   ;;  %v516_v13 = vld [vmem:[%s605_s2 + $0x20] sm:$0xff] (!%p146_p2)   ;;  %vm384_vm4 = vcmask (!%p146_p2), 0  }
   0x7   : > { %v202_v3 = vshrl.u32 (!%p146_p2), %v201_v0, 7  ;;  %v204_v4 = vand.u32 (!%p146_p2), 127, %v201_v0  ;;  %482 = vmatprep.subr.bf16.mxu1 (!%p146_p2), %v532_v1  ;;  %498 = vmatprep.mubr.msk.bf16.mxu1 (!%p146_p2), %vm533_vm0, %v532_v1  ;;  %v517_v14 = vld [vmem:[%s605_s2 + $0x28] sm:$0xff] (!%p146_p2)   ;;  %v518_v15 = vld [vmem:[%s605_s2 + $0x30] sm:$0xff] (!%p146_p2)   ;;  %v519_v16 = vld [vmem:[%s605_s2 + $0x38] sm:$0xff] (!%p146_p2)  }
   0x8   : > { %483 = vmatpush3.bf16.msra.mxu1 (!%p146_p2), %v512_v2 }
   0x9   : > { %vm205_vm2 = vcmp.lt.s32.totalorder (!%p146_p2), %v204_v4, %v202_v3  ;;  %484 = vmatprep.subr.bf16.mxu1 (!%p146_p2), %v532_v1  ;;  %v355_v27 = vmul.u32 (!%p146_p2), 128, %v202_v3 }
   0xa   : > { %v452_v6 = vsel (!%p146_p2), %vm205_vm2, 1.0, %v532_v1 }
   0xb   : > { %v208_v9 = vpack.c.bf16 (!%p146_p2), %v452_v6, %v452_v6  ;;  %v356_v29 = vadd.s32 (!%p146_p2), %v355_v27, %v204_v4 }
   0xc   : > { %485 = vmatpush3.bf16.msra.mxu1 (!%p146_p2), %v513_v5 }
   0xd   : > { %s608_s13 = smov (!%p170_p3, %s445_s13), 1  ;;  %486 = vmatprep.subr.bf16.mxu1 %v532_v1  ;;  %v357_v31 = vadd.s32 1, %v356_v29 }
   0xe   : > { %s451_s18 = sshll.u32 %s608_s13, 2  ;;  %s450_s7 = sshll.u32 %s608_s13, 3 }
   0xf   : > { %s177_s21 = scalar_lea.vmem %s604_s1, %s451_s18  ;;  %v358_v33 = vcvt.s32.f32 %v357_v31  ;;  %s173_s10 = scalar_lea.vmem %s603_s0, %s450_s7 }
  0x10   : > { %v183_v7 = vld [vmem:[%s177_s21] sm:$0xf]  ;;  %487 = vmatpush3.bf16.msra.mxu1 %v514_v10  ;;  %s180_s15 = scalar_lea.vmem %s606_s3, %s608_s13 }
  0x11   : > { %v215_v8 = vsel %vm213_vm1, %v183_v7, 0  ;;  %v184_v11 = vunpack.c.l.bf16 %v183_v7  ;;  %488 = vmatprep.subr.bf16.mxu1 %v532_v1  ;;  %v462_v36 = vadd.f32 -1.0, %v358_v33  ;;  %v182_v49 = vld [vmem:[%s173_s10] sm:$0xff] }
  0x12   : > { %477 = vmatpush3.bf16.msra.mxu0 %v215_v8  ;;  %v374_v53 = vmax.f32 %v182_v49, 0.0 }
  0x13   : > { %347 = vadd.xlane.f32.xlu0 %v184_v11 }
  0x14   : > { %489 = vmatpush3.bf16.msra.mxu1 %v515_v12 }
  0x15   : > { %479 = vmatmul.mubr.msk.bf16.vlgmr.msra.gmra.mrb[0].mxu0 %vm209_vm3, %v208_v9  ;;  %490 = vmatprep.subr.bf16.mxu1 %v532_v1 }
  0x18   : > { %491 = vmatpush3.bf16.msra.mxu1 %v516_v13 }
  0x19   : > { %492 = vmatprep.subr.bf16.mxu1 %v532_v1 }
  0x1c   : > { %493 = vmatpush3.bf16.msra.mxu1 %v517_v14 }
  0x1d   : > { %494 = vmatprep.subr.bf16.mxu1 %v532_v1 }
  0x20   : > { %495 = vmatpush3.bf16.msra.mxu1 %v518_v15 }
  0x21   : > { %496 = vmatprep.subr.bf16.mxu1 %v532_v1 }
  0x24   : > { %497 = vmatpush3.bf16.msra.mxu1 %v519_v16 }
  0x27   : > { %499 = vmatmul.mubr.bf16.vlgmr.msra.gmra.mrb[0].mxu1 %v183_v7 }
  0xa0   : > { %v348_v25 = vpop.xlane.xlu0 %347 }
  0xa1   : > { %v349_v26 = vrot.slane %v348_v25, 4 }
  0xa3   : > { %v350_v28 = vadd.f32 %v349_v26, %v348_v25 }
  0xa5   : > { %v351_v30 = vrot.slane %v350_v28, 2 }
  0xa7   : > { %v352_v32 = vadd.f32 %v351_v30, %v350_v28 }
  0xa9   : > { %v353_v34 = vrot.slane %v352_v32, 1 }
  0xab   : > { %v354_v38 = vadd.f32 %v353_v34, %v352_v32 }
  0xe8   : > { %v251_v17 = vpop.f32.mrb[0].mxu0 }
  0xe9   : > { %v480_v18 = vpop.f32.mrb[1].mxu0  ;;  %257 = vadd.xlane.f32.xlu0 %v251_v17 }
  0xea   : > { %v254_v19 = vpop.f32.mrb[2].mxu0 }
  0xeb   : > { %v481_v20 = vpop.f32.mrb[3].mxu0 }
  0xfa   : > { %v341_v21 = vpop.f32.mrb[0].mxu1 }
  0xfb   : > { %v500_v22 = vpop.f32.mrb[1].mxu1 }
  0xfc   : > { %v344_v23 = vpop.f32.mrb[2].mxu1 }
  0xfd   : > { %v501_v24 = vpop.f32.mrb[3].mxu1 }
 0x176   : > { %v258_v35 = vpop.xlane.xlu0 %257 }
 0x177   : > { %v342_v37 = vadd.f32 %v341_v21, %v258_v35 }
 0x179   : > { %v360_v39 = vsub.f32 %v358_v33, %v342_v37  ;;  %v365_v40 = vsub.f32 %v342_v37, %v184_v11  ;;  %v359_v44 = vsub.f32 %v354_v38, %v342_v37 }
 0x17b   : > { %v361_v41 = vadd.f32 %v360_v39, %v354_v38  ;;  %v368_v42 = vsub.f32 %v462_v36, %v365_v40  ;;  %v366_v47 = vsub.f32 %v354_v38, %v365_v40 }
 0x17d   : > { %520 = vrcp.f32 %v361_v41  ;;  %v369_v43 = vadd.f32 %v368_v42, %v354_v38 }
 0x17f   : > { %522 = vrcp.f32 %v369_v43 }
 0x187   : > { %v521_v45 = vpop.eup %520 }
 0x188   : > { %v363_v46 = vmul.f32 %v521_v45, %v359_v44 }
 0x189   : > { %v523_v48 = vpop.eup %522 }
 0x18a   : > { %v371_v50 = vmul.f32 %v523_v48, %v366_v47  ;;  %v364_v51 = vsub.f32 1.0, %v363_v46 }
 0x18c   : > { %v372_v52 = vsub.f32 1.0, %v371_v50 }
 0x18e   : > { %v373_v54 = vsub.f32 %v364_v51, %v372_v52 }
 0x190   : > { %v375_v55 = vmul.f32 %v374_v53, %v373_v54 }
 0x192   : > { %376 = vadd.xlane.f32.xlu1 %v375_v55 }
 0x21f   : > { %v377_v56 = vpop.xlane.xlu1 %376 }
 0x220   : > { %v378_v57 = vrot.slane %v377_v56, 4 }
 0x222   : > { %v379_v58 = vadd.f32 %v378_v57, %v377_v56 }
 0x224   : > { %v380_v59 = vrot.slane %v379_v58, 2 }
 0x226   : > { %v381_v60 = vadd.f32 %v380_v59, %v379_v58 }
 0x228   : > { %v382_v61 = vrot.slane %v381_v60, 1 }
 0x22a   : > { %v383_v62 = vadd.f32 %v382_v61, %v381_v60 }
 0x22c   : > { %385 = vst.msk [vmem:[%s180_s15] sm:$0x1] %vm384_vm4, %v383_v62 }
 0x22d PF: > { %s13_s12 = sadd.s32 1, %s530_s12  }
 0x22e   : > { %p10_p4 = scmp.ge.s32.totalorder %s13_s12, 4  }
 0x230   :  { %12 = sbr.rel (!%p10_p4) target bundleno = 1 (0x1), region = 65 }

</bundles_post_ra>
